<compile_context>
chip_gen: v5e
topology: v5e:2x2
jax: 0.10.0
libtpu: 0.0.40
codegen_flags: <defaults>
</compile_context>

<pallas_src>
import functools

import jax
import jax.numpy as jnp
from jax.experimental import pallas as pl
from jax.experimental.pallas import tpu as pltpu

BN_EPS = 1e-5
LEAKY_SLOPE = 0.1
LANE = 128


def _round_up(x, m):
    return (x + m - 1) // m * m


def _vmem_budget_and_limit():
    """Per-generation VMEM budget for the pipelined working set (bytes)."""
    try:
        info = pltpu.get_tpu_info()
        cap = getattr(info, "vmem_capacity_bytes", None)
        if cap is not None and cap >= 100 * 1024 * 1024:        # v5e / v6e: 128 MiB VMEM
            return 24 * 1024 * 1024, 64 * 1024 * 1024
    except Exception:
        pass
    return 12 * 1024 * 1024, 32 * 1024 * 1024                   # v7x-safe (64 MiB VMEM)


def _pick_row_tile(n_rows, kdim_p, cout_p, budget_bytes):
    # pass 1 per row: double-buffered bf16 patches + double-buffered bf16 conv-out
    # pass 2 per row: double-buffered bf16 in + double-buffered f32 out
    per_row = max(2 * kdim_p * 2 + 2 * cout_p * 2,
                  2 * cout_p * 2 + 2 * cout_p * 4)
    resident = 2 * kdim_p * cout_p * 2 + 8 * cout_p * 4          # weight + stat accumulators
    tr = (budget_bytes - resident) // max(per_row, 1)
    tr = max(8, (tr // 8) * 8)
    tr = min(tr, 1024)                        # 512-1024 rows amortize per-step grid overhead
    tr = min(tr, _round_up(n_rows, 8))        # don't over-pad tiny problems
    return tr


def _conv_stats_kernel(p_ref, w_ref, y_ref, sum_ref, ssq_ref):
    """One row tile of the conv matmul; accumulates per-channel sum / sum-of-squares."""
    @pl.when(pl.program_id(0) == 0)
    def _init():
        sum_ref[...] = jnp.zeros_like(sum_ref)
        ssq_ref[...] = jnp.zeros_like(ssq_ref)

    acc = jnp.dot(p_ref[...], w_ref[...], preferred_element_type=jnp.float32)
    y_ref[...] = acc.astype(y_ref.dtype)                    # bf16 intermediate writeback
    sum_ref[...] += jnp.sum(acc, axis=0, keepdims=True)     # exact f32 stats
    ssq_ref[...] += jnp.sum(acc * acc, axis=0, keepdims=True)


def _bn_act_kernel(y_ref, sum_ref, ssq_ref, gamma_ref, beta_ref, o_ref, *, inv_count):
    """Per-channel scale/shift from raw stats, then FMA + LeakyReLU.  Megacore-parallel."""
    mean = sum_ref[...] * inv_count
    var = jnp.maximum(ssq_ref[...] * inv_count - mean * mean, 0.0)
    scale = gamma_ref[...] * jax.lax.rsqrt(var + BN_EPS)     # EUP rsqrt, one vreg per tile
    shift = beta_ref[...] - mean * scale
    z = y_ref[...].astype(jnp.float32) * scale + shift
    o_ref[...] = jnp.where(z > 0, z, LEAKY_SLOPE * z).astype(o_ref.dtype)


def cnn_block_forward(x, conv_w, gamma, beta, *, stride=1, padding=1):
    """x: [N, Cin, H, W] f32; conv_w: [Cout, Cin, KH, KW]; gamma/beta: [Cout]."""
    N, Cin, H, W = x.shape
    Cout, _, KH, KW = conv_w.shape
    OH = (H + 2 * padding - KH) // stride + 1
    OW = (W + 2 * padding - KW) // stride + 1

    # --- glue: im2col (plain JAX) ---
    # TODO(synk): fuse the im2col expansion into the kernel (halo-tiled NHWC conv with
    # per-tap shifted matmuls) to avoid the KH*KW x HBM inflation of the activations.
    xp = jnp.pad(x, ((0, 0), (0, 0), (padding, padding), (padding, padding)))
    cols = []
    for kh in range(KH):
        for kw in range(KW):
            cols.append(xp[:, :, kh:kh + OH * stride:stride, kw:kw + OW * stride:stride])
    patches = jnp.stack(cols, axis=2)                        # [N, Cin, K*K, OH, OW]
    patches = patches.transpose(0, 3, 4, 1, 2).reshape(N * OH * OW, Cin * KH * KW)

    R, Kdim = patches.shape
    Kdim_p = _round_up(Kdim, LANE)
    Cout_p = _round_up(Cout, LANE)

    budget, vmem_limit = _vmem_budget_and_limit()
    TR = _pick_row_tile(R, Kdim_p, Cout_p, budget)
    R_p = _round_up(R, TR)
    n_tiles = R_p // TR

    # zero-padding: padded rows/cols contribute exactly 0 to matmul and BN sums
    patches_p = jnp.pad(patches, ((0, R_p - R), (0, Kdim_p - Kdim))).astype(jnp.bfloat16)
    w2d = conv_w.reshape(Cout, Kdim).T.astype(jnp.float32)
    w2d_p = jnp.pad(w2d, ((0, Kdim_p - Kdim), (0, Cout_p - Cout))).astype(jnp.bfloat16)
    gamma_p = jnp.pad(gamma.astype(jnp.float32), (0, Cout_p - Cout)).reshape(1, Cout_p)
    beta_p = jnp.pad(beta.astype(jnp.float32), (0, Cout_p - Cout)).reshape(1, Cout_p)

    # ---- pass 1: conv matmul + per-channel sum / sumsq --------------------------------
    cost1 = pl.CostEstimate(
        flops=2 * R_p * Kdim_p * Cout_p,
        transcendentals=0,
        bytes_accessed=patches_p.size * 2 + w2d_p.size * 2 + R_p * Cout_p * 2)

    conv_out, ch_sum, ch_ssq = pl.pallas_call(
        _conv_stats_kernel,
        out_shape=(jax.ShapeDtypeStruct((R_p, Cout_p), jnp.bfloat16),
                   jax.ShapeDtypeStruct((1, Cout_p), jnp.float32),
                   jax.ShapeDtypeStruct((1, Cout_p), jnp.float32)),
        grid=(n_tiles,),
        in_specs=[pl.BlockSpec((TR, Kdim_p), lambda i: (i, 0)),
                  pl.BlockSpec((Kdim_p, Cout_p), lambda i: (0, 0))],
        out_specs=(pl.BlockSpec((TR, Cout_p), lambda i: (i, 0)),
                   pl.BlockSpec((1, Cout_p), lambda i: (0, 0)),
                   pl.BlockSpec((1, Cout_p), lambda i: (0, 0))),
        compiler_params=pltpu.CompilerParams(
            dimension_semantics=("arbitrary",),          # stats accumulate across row tiles
            vmem_limit_bytes=vmem_limit),
        cost_estimate=cost1,
    )(patches_p, w2d_p)

    # ---- pass 2: normalize + LeakyReLU, stats->scale/shift folded into the kernel -----
    cost2 = pl.CostEstimate(
        flops=4 * R_p * Cout_p,
        transcendentals=n_tiles * Cout_p,
        bytes_accessed=R_p * Cout_p * 2 + R_p * Cout_p * 4)

    out2d = pl.pallas_call(
        functools.partial(_bn_act_kernel, inv_count=1.0 / float(R)),
        out_shape=jax.ShapeDtypeStruct((R_p, Cout_p), jnp.float32),
        grid=(n_tiles,),
        in_specs=[pl.BlockSpec((TR, Cout_p), lambda i: (i, 0)),
                  pl.BlockSpec((1, Cout_p), lambda i: (0, 0)),
                  pl.BlockSpec((1, Cout_p), lambda i: (0, 0)),
                  pl.BlockSpec((1, Cout_p), lambda i: (0, 0)),
                  pl.BlockSpec((1, Cout_p), lambda i: (0, 0))],
        out_specs=pl.BlockSpec((TR, Cout_p), lambda i: (i, 0)),
        compiler_params=pltpu.CompilerParams(
            dimension_semantics=("parallel",),
            vmem_limit_bytes=vmem_limit),
        cost_estimate=cost2,
    )(conv_out, ch_sum, ch_ssq, gamma_p, beta_p)

    # back to NCHW, dropping row / channel padding
    return out2d[:R, :Cout].reshape(N, OH, OW, Cout).transpose(0, 3, 1, 2)


def _reference(x, conv_w, gamma, beta, *, stride, padding):
    y = jax.lax.conv_general_dilated(
        x, conv_w, window_strides=(stride, stride),
        padding=[(padding, padding), (padding, padding)],
        dimension_numbers=("NCHW", "OIHW", "NCHW"))
    mean = y.mean(axis=(0, 2, 3), keepdims=True)
    var = ((y - mean) ** 2).mean(axis=(0, 2, 3), keepdims=True)
    z = gamma.reshape(1, -1, 1, 1) * (y - mean) * jax.lax.rsqrt(var + BN_EPS) \
        + beta.reshape(1, -1, 1, 1)
    return jnp.where(z > 0, z, LEAKY_SLOPE * z)


if __name__ == "__main__":
    key = jax.random.PRNGKey(0)
    k_x, k_w, k_g, k_b = jax.random.split(key, 4)

    # small shapes consistent with the module: CNNBlock(4, 8, kernel_size=3, stride=1, padding=1)
    N, Cin, H, W = 2, 4, 16, 16
    Cout, K = 8, 3

    x = jax.random.normal(k_x, (N, Cin, H, W), dtype=jnp.float32)
    conv_w = 0.1 * jax.random.normal(k_w, (Cout, Cin, K, K), dtype=jnp.float32)
    gamma = 1.0 + 0.1 * jax.random.normal(k_g, (Cout,), dtype=jnp.float32)
    beta = 0.1 * jax.random.normal(k_b, (Cout,), dtype=jnp.float32)

    out = cnn_block_forward(x, conv_w, gamma, beta, stride=1, padding=1)
    out = jax.block_until_ready(out)
    assert out.shape == (N, Cout, H, W), out.shape

    ref = _reference(x, conv_w, gamma, beta, stride=1, padding=1)
    max_err = float(jnp.max(jnp.abs(out - ref)))
    assert max_err < 0.1, f"max abs error vs reference = {max_err}"

    print("KERNEL_OK")
</pallas_src>

<mosaic_0001>
module attributes {stable_mosaic.version = 11 : i64} {
  func.func @_conv_stats_kernel(%arg0: i32, %arg1: memref<512x128xbf16, #tpu.memory_space<vmem>>, %arg2: memref<128x128xbf16, #tpu.memory_space<vmem>>, %arg3: memref<512x128xbf16, #tpu.memory_space<vmem>>, %arg4: memref<1x128xf32, #tpu.memory_space<vmem>>, %arg5: memref<1x128xf32, #tpu.memory_space<vmem>>) attributes {dimension_semantics = [#tpu.dimension_semantics<arbitrary>], iteration_bounds = array<i64: 1>, scalar_prefetch = 0 : i64, scratch_operands = 0 : i64, tpu.core_type = #tpu.core_type<tc>, window_params = [{transform_indices = @transform_0, window_bounds = array<i64: 512, 128>}, {pipeline_mode = #tpu.pipeline_mode<synchronous>, transform_indices = @transform_1, window_bounds = array<i64: 128, 128>}, {transform_indices = @transform_2, window_bounds = array<i64: 512, 128>}, {pipeline_mode = #tpu.pipeline_mode<synchronous>, transform_indices = @transform_3, window_bounds = array<i64: 1, 128>}, {pipeline_mode = #tpu.pipeline_mode<synchronous>, transform_indices = @transform_4, window_bounds = array<i64: 1, 128>}]} {
    %c0_i32 = arith.constant 0 : i32
    %0 = arith.cmpi eq, %arg0, %c0_i32 : i32
    %1 = arith.extui %0 : i1 to i32
    %c0_i32_0 = arith.constant 0 : i32
    %2 = arith.cmpi ne, %1, %c0_i32_0 : i32
    scf.if %2 {
      %cst_16 = arith.constant 0.000000e+00 : f32
      %19 = vector.broadcast %cst_16 : f32 to vector<1x128xf32>
      %c0_17 = arith.constant 0 : index
      %c0_18 = arith.constant 0 : index
      %20 = vector.load %arg4[%c0_17, %c0_18] : memref<1x128xf32, #tpu.memory_space<vmem>>, vector<1x128xf32>
      tpu.vector_store %arg4[%c0_17, %c0_18], %19 {strides = array<i32>} : memref<1x128xf32, #tpu.memory_space<vmem>>, vector<1x128xf32>,
      %cst_19 = arith.constant 0.000000e+00 : f32
      %21 = vector.broadcast %cst_19 : f32 to vector<1x128xf32>
      %c0_20 = arith.constant 0 : index
      %c0_21 = arith.constant 0 : index
      %22 = vector.load %arg5[%c0_20, %c0_21] : memref<1x128xf32, #tpu.memory_space<vmem>>, vector<1x128xf32>
      tpu.vector_store %arg5[%c0_20, %c0_21], %21 {strides = array<i32>} : memref<1x128xf32, #tpu.memory_space<vmem>>, vector<1x128xf32>,
    } else {
    }
    %c0 = arith.constant 0 : index
    %c0_1 = arith.constant 0 : index
    %3 = vector.load %arg1[%c0, %c0_1] : memref<512x128xbf16, #tpu.memory_space<vmem>>, vector<512x128xbf16>
    %c0_2 = arith.constant 0 : index
    %c0_3 = arith.constant 0 : index
    %4 = vector.load %arg2[%c0_2, %c0_3] : memref<128x128xbf16, #tpu.memory_space<vmem>>, vector<128x128xbf16>
    %cst = arith.constant dense<0.000000e+00> : vector<512x128xf32>
    %5 = tpu.matmul %3, %4, %cst {dimension_numbers = #tpu.dot_dimension_numbers<[1], [0], [0], [1], [0, 0, 1, 1], [], []>} : vector<512x128xbf16>, vector<128x128xbf16>, vector<512x128xf32> -> vector<512x128xf32>
    %6 = arith.truncf %5 : vector<512x128xf32> to vector<512x128xbf16>
    %c0_4 = arith.constant 0 : index
    %c0_5 = arith.constant 0 : index
    %7 = vector.load %arg3[%c0_4, %c0_5] : memref<512x128xbf16, #tpu.memory_space<vmem>>, vector<512x128xbf16>
    tpu.vector_store %arg3[%c0_4, %c0_5], %6 {strides = array<i32>} : memref<512x128xbf16, #tpu.memory_space<vmem>>, vector<512x128xbf16>,
    %c0_6 = arith.constant 0 : index
    %c0_7 = arith.constant 0 : index
    %8 = vector.load %arg4[%c0_6, %c0_7] : memref<1x128xf32, #tpu.memory_space<vmem>>, vector<1x128xf32>
    %cst_8 = arith.constant dense<0.000000e+00> : vector<128xf32>
    %9 = vector.multi_reduction <add>, %5, %cst_8 [0] : vector<512x128xf32> to vector<128xf32>
    %10 = vector.shape_cast %9 : vector<128xf32> to vector<1x128xf32>
    %11 = arith.addf %8, %10 : vector<1x128xf32>
    %c0_9 = arith.constant 0 : index
    %c0_10 = arith.constant 0 : index
    %12 = vector.load %arg4[%c0_9, %c0_10] : memref<1x128xf32, #tpu.memory_space<vmem>>, vector<1x128xf32>
    tpu.vector_store %arg4[%c0_9, %c0_10], %11 {strides = array<i32>} : memref<1x128xf32, #tpu.memory_space<vmem>>, vector<1x128xf32>,
    %c0_11 = arith.constant 0 : index
    %c0_12 = arith.constant 0 : index
    %13 = vector.load %arg5[%c0_11, %c0_12] : memref<1x128xf32, #tpu.memory_space<vmem>>, vector<1x128xf32>
    %14 = arith.mulf %5, %5 : vector<512x128xf32>
    %cst_13 = arith.constant dense<0.000000e+00> : vector<128xf32>
    %15 = vector.multi_reduction <add>, %14, %cst_13 [0] : vector<512x128xf32> to vector<128xf32>
    %16 = vector.shape_cast %15 : vector<128xf32> to vector<1x128xf32>
    %17 = arith.addf %13, %16 : vector<1x128xf32>
    %c0_14 = arith.constant 0 : index
    %c0_15 = arith.constant 0 : index
    %18 = vector.load %arg5[%c0_14, %c0_15] : memref<1x128xf32, #tpu.memory_space<vmem>>, vector<1x128xf32>
    tpu.vector_store %arg5[%c0_14, %c0_15], %17 {strides = array<i32>} : memref<1x128xf32, #tpu.memory_space<vmem>>, vector<1x128xf32>,
    return
  }
  func.func @transform_0(%arg0: i32) -> (i32, i32) {
    %c0_i32 = arith.constant 0 : i32
    %c0_i32_0 = arith.constant 0 : i32
    return %arg0, %c0_i32 : i32, i32
  }
  func.func @transform_1(%arg0: i32) -> (i32, i32) {
    %c0_i32 = arith.constant 0 : i32
    %c0_i32_0 = arith.constant 0 : i32
    %c0_i32_1 = arith.constant 0 : i32
    return %c0_i32, %c0_i32_0 : i32, i32
  }
  func.func @transform_2(%arg0: i32) -> (i32, i32) {
    %c0_i32 = arith.constant 0 : i32
    %c0_i32_0 = arith.constant 0 : i32
    return %arg0, %c0_i32 : i32, i32
  }
  func.func @transform_3(%arg0: i32) -> (i32, i32) {
    %c0_i32 = arith.constant 0 : i32
    %c0_i32_0 = arith.constant 0 : i32
    %c0_i32_1 = arith.constant 0 : i32
    return %c0_i32, %c0_i32_0 : i32, i32
  }
  func.func @transform_4(%arg0: i32) -> (i32, i32) {
    %c0_i32 = arith.constant 0 : i32
    %c0_i32_0 = arith.constant 0 : i32
    %c0_i32_1 = arith.constant 0 : i32
    return %c0_i32, %c0_i32_0 : i32, i32
  }
}

</mosaic_0001>

<bundles_post_ra>
// kernel: tpu_custom_call.1
= control target key start
LH: loop header
LB: loop body
LE: loop exit
PB: predicated region body
PF: predicated region fallthrough
CT: control target
= control target key end

     0   :  { %10 = vsyncpa [#allocation3], 0  ;;  %s1832_s0 = inlined_call_operand.hbm [shape: bf16[512,128], index: 0, kind: input, shape index: {}]   ;;  %s1833_s1 = inlined_call_operand.hbm [shape: bf16[128,128], index: 1, kind: input, shape index: {}]   ;;  %s1834_s2 = inlined_call_operand.hbm [shape: bf16[512,128], index: 2, kind: output, shape index: {0}]   ;;  %s1835_s3 = inlined_call_operand.hbm [shape: f32[1,128], index: 3, kind: output, shape index: {1}]   ;;  %s1836_s4 = inlined_call_operand.hbm [shape: f32[1,128], index: 4, kind: output, shape index: {2}]  }
   0x1   :  { %11 = vsyncpa [#allocation6], 0 }
   0x2   :  { %12 = vsyncpa [#allocation4], 0 }
   0x3   :  { %13 = vsyncpa [#allocation9], 0  ;;  %s18_s17 = sshll.u32 %s1832_s0, 4  ;;  %s1481_s18 = smov [#allocation2]   ;;  %s19_s17 = int_to_ptr.hbm [resolvable:$true] %s18_s17 }
   0x4   :  { %s20_s19 = sshll.u32 %s1481_s18, 4  ;;  %s31_s22 = sshll.u32 %s1833_s1, 4  ;;  %s21_s19 = int_to_ptr.vmem [resolvable:$true] %s20_s19  ;;  %s32_s22 = int_to_ptr.hbm [resolvable:$true] %s31_s22 }
   0x5   :  { %s1482_s23 = smov 64   ;;  %s1483_s24 = smov 4  }
   0x6   :  { %26 = dma.hbm_to_vmem [thread:$0]  %s19_s17, 4096, %s21_s19, [#allocation3], %s1482_s23, %s1482_s23, %s1483_s24  }
   0x7   :  { %s1484_s25 = smov [#allocation5]  }
   0x8   :  { %s33_s26 = sshll.u32 %s1484_s25, 4  ;;  %s34_s26 = int_to_ptr.vmem [resolvable:$true] %s33_s26 }
   0x9   :  { %39 = dma.hbm_to_vmem [thread:$0]  %s32_s22, 1024, %s34_s26, [#allocation6], %s1482_s23, %s1482_s23, %s1483_s24  }
   0xa   :  { %1473 = dma.done.wait [#allocation3], 4096  }
   0xb   :  { %1474 = vsyncadd [#allocation3], 4294963200 }
   0xc   :  { %1475 = dma.done.wait [#allocation6], 1024  }
   0xd   :  { %1476 = vsyncadd [#allocation6], 4294966272  ;;  %v1129_v0 = vld [vmem:[#allocation5 + $0x38] sm:$0xff]  ;;  %v1128_v1 = vld [vmem:[#allocation5 + $0x30] sm:$0xff]  ;;  %s1485_s0 = smov [#allocation7]   ;;  %s885_s29 = sshll.u32 %s1834_s2, 4  ;;  %s886_s29 = int_to_ptr.hbm [resolvable:$true] %s885_s29 }
   0xe   :  { %374 = vmatpush.bf16.msra.mxu0 %v1129_v0  ;;  %1321 = vmatpush.bf16.msra.mxu1 %v1129_v0  ;;  %v1127_v2 = vld [vmem:[#allocation5 + $0x28] sm:$0xff]  ;;  %v1126_v3 = vld [vmem:[#allocation5 + $0x20] sm:$0xff]  ;;  %v1125_v4 = vld [vmem:[#allocation5 + $0x18] sm:$0xff]  ;;  %s883_s1 = sshll.u32 %s1485_s0, 4  ;;  %s1487_s2 = smov [#allocation8]   ;;  %s884_s1 = int_to_ptr.vmem [resolvable:$true] %s883_s1 }
   0xf   :  { %1322 = vmatpush.bf16.msra.mxu2 %v1129_v0  ;;  %1323 = vmatpush.bf16.msra.mxu3 %v1129_v0  ;;  %v1124_v5 = vld [vmem:[#allocation5 + $0x10] sm:$0xff]  ;;  %v1123_v6 = vld [vmem:[#allocation5 + $0x8] sm:$0xff]  ;;  %v1122_v7 = vld [vmem:[#allocation5] sm:$0xff]  ;;  %s897_s30 = sshll.u32 %s1487_s2, 4  ;;  %s899_s7 = sshll.u32 %s1835_s3, 4  ;;  %s898_s30 = int_to_ptr.vmem [resolvable:$true] %s897_s30  ;;  %s900_s7 = int_to_ptr.hbm [resolvable:$true] %s899_s7 }
  0x10   :  { %v1090_v8 = vld [vmem:[#allocation2] sm:$0xff]  ;;  %v1091_v10 = vld [vmem:[#allocation2 + $0x8] sm:$0xff]  ;;  %v1092_v13 = vld [vmem:[#allocation2 + $0x10] sm:$0xff]  ;;  %s1488_s8 = smov [#allocation10]   ;;  %s910_s12 = sshll.u32 %s1836_s4, 4  ;;  %s911_s12 = int_to_ptr.hbm [resolvable:$true] %s910_s12 }
  0x11   :  { %v1098_v9 = vld [vmem:[#allocation2 + $0x40] sm:$0xff]  ;;  %v1099_v11 = vld [vmem:[#allocation2 + $0x48] sm:$0xff]  ;;  %v1100_v14 = vld [vmem:[#allocation2 + $0x50] sm:$0xff]  ;;  %s908_s9 = sshll.u32 %s1488_s8, 4  ;;  %s909_s9 = int_to_ptr.vmem [resolvable:$true] %s908_s9 }
  0x12   :  { %375 = vmatpush.bf16.msra.mxu0 %v1128_v1  ;;  %1324 = vmatpush.bf16.msra.mxu1 %v1128_v1  ;;  %v1106_v12 = vld [vmem:[#allocation2 + $0x80] sm:$0xff]  ;;  %v1107_v15 = vld [vmem:[#allocation2 + $0x88] sm:$0xff]  ;;  %v1093_v16 = vld [vmem:[#allocation2 + $0x18] sm:$0xff] }
  0x13   :  { %1325 = vmatpush.bf16.msra.mxu2 %v1128_v1  ;;  %1326 = vmatpush.bf16.msra.mxu3 %v1128_v1  ;;  %v1101_v17 = vld [vmem:[#allocation2 + $0x58] sm:$0xff]  ;;  %v1108_v18 = vld [vmem:[#allocation2 + $0x90] sm:$0xff]  ;;  %v1114_v19 = vld [vmem:[#allocation2 + $0xc0] sm:$0xff] }
  0x14   :  { %v1094_v20 = vld [vmem:[#allocation2 + $0x20] sm:$0xff]  ;;  %v1109_v22 = vld [vmem:[#allocation2 + $0x98] sm:$0xff]  ;;  %v1115_v23 = vld [vmem:[#allocation2 + $0xc8] sm:$0xff] }
  0x15   :  { %v1102_v21 = vld [vmem:[#allocation2 + $0x60] sm:$0xff]  ;;  %v1095_v24 = vld [vmem:[#allocation2 + $0x28] sm:$0xff]  ;;  %v1116_v27 = vld [vmem:[#allocation2 + $0xd0] sm:$0xff] }
  0x16   :  { %376 = vmatpush.bf16.msra.mxu0 %v1127_v2  ;;  %1327 = vmatpush.bf16.msra.mxu1 %v1127_v2  ;;  %v1103_v25 = vld [vmem:[#allocation2 + $0x68] sm:$0xff]  ;;  %v1110_v26 = vld [vmem:[#allocation2 + $0xa0] sm:$0xff]  ;;  %v1096_v28 = vld [vmem:[#allocation2 + $0x30] sm:$0xff] }
  0x17   :  { %1328 = vmatpush.bf16.msra.mxu2 %v1127_v2  ;;  %1329 = vmatpush.bf16.msra.mxu3 %v1127_v2  ;;  %v1104_v29 = vld [vmem:[#allocation2 + $0x70] sm:$0xff]  ;;  %v1111_v30 = vld [vmem:[#allocation2 + $0xa8] sm:$0xff]  ;;  %v1117_v31 = vld [vmem:[#allocation2 + $0xd8] sm:$0xff] }
  0x18   :  { %v1097_v32 = vld [vmem:[#allocation2 + $0x38] sm:$0xff]  ;;  %v1112_v34 = vld [vmem:[#allocation2 + $0xb0] sm:$0xff]  ;;  %v1118_v35 = vld [vmem:[#allocation2 + $0xe0] sm:$0xff] }
  0x19   :  { %v1105_v33 = vld [vmem:[#allocation2 + $0x78] sm:$0xff]  ;;  %v1119_v39 = vld [vmem:[#allocation2 + $0xe8] sm:$0xff]  ;;  %v1120_v53 = vld [vmem:[#allocation2 + $0xf0] sm:$0xff] }
  0x1a   :  { %377 = vmatpush.bf16.msra.mxu0 %v1126_v3  ;;  %1330 = vmatpush.bf16.msra.mxu1 %v1126_v3  ;;  %v1113_v38 = vld [vmem:[#allocation2 + $0xb8] sm:$0xff] }
  0x1b   :  { %1331 = vmatpush.bf16.msra.mxu2 %v1126_v3  ;;  %1332 = vmatpush.bf16.msra.mxu3 %v1126_v3 }
  0x1e   :  { %378 = vmatpush.bf16.msra.mxu0 %v1125_v4  ;;  %1333 = vmatpush.bf16.msra.mxu1 %v1125_v4 }
  0x1f   :  { %1334 = vmatpush.bf16.msra.mxu2 %v1125_v4  ;;  %1335 = vmatpush.bf16.msra.mxu3 %v1125_v4 }
  0x22   :  { %379 = vmatpush.bf16.msra.mxu0 %v1124_v5  ;;  %1336 = vmatpush.bf16.msra.mxu1 %v1124_v5 }
  0x23   :  { %1337 = vmatpush.bf16.msra.mxu2 %v1124_v5  ;;  %1338 = vmatpush.bf16.msra.mxu3 %v1124_v5  ;;  %v1121_v5 = vld [vmem:[#allocation2 + $0xf8] sm:$0xff] }
  0x26   :  { %380 = vmatpush.bf16.msra.mxu0 %v1123_v6  ;;  %1339 = vmatpush.bf16.msra.mxu1 %v1123_v6 }
  0x27   :  { %1340 = vmatpush.bf16.msra.mxu2 %v1123_v6  ;;  %1341 = vmatpush.bf16.msra.mxu3 %v1123_v6 }
  0x2a   :  { %381 = vmatpush.bf16.msra.mxu0 %v1122_v7  ;;  %1342 = vmatpush.bf16.msra.mxu1 %v1122_v7 }
  0x2b   :  { %1343 = vmatpush.bf16.msra.mxu2 %v1122_v7  ;;  %1344 = vmatpush.bf16.msra.mxu3 %v1122_v7 }
  0x2d   :  { %382 = vmatmul.bf16.vlgmr.msra.gmra.mxu0 %v1090_v8  ;;  %422 = vmatmul.bf16.vlgmr.msra.gmra.mxu1 %v1098_v9 }
  0x2e   :  { %462 = vmatmul.bf16.vlgmr.msra.gmra.mxu2 %v1106_v12  ;;  %502 = vmatmul.bf16.vlgmr.msra.gmra.mxu3 %v1114_v19 }
  0x3d   :  { %387 = vmatmul.bf16.gmra.mxu0 %v1091_v10  ;;  %427 = vmatmul.bf16.gmra.mxu1 %v1099_v11 }
  0x3e   :  { %467 = vmatmul.bf16.gmra.mxu2 %v1107_v15  ;;  %507 = vmatmul.bf16.gmra.mxu3 %v1115_v23 }
  0x4d   :  { %392 = vmatmul.bf16.gmra.mxu0 %v1092_v13  ;;  %432 = vmatmul.bf16.gmra.mxu1 %v1100_v14 }
  0x4e   :  { %472 = vmatmul.bf16.gmra.mxu2 %v1108_v18  ;;  %512 = vmatmul.bf16.gmra.mxu3 %v1116_v27 }
  0x5d   :  { %397 = vmatmul.bf16.gmra.mxu0 %v1093_v16  ;;  %437 = vmatmul.bf16.gmra.mxu1 %v1101_v17 }
  0x5e   :  { %477 = vmatmul.bf16.gmra.mxu2 %v1109_v22  ;;  %517 = vmatmul.bf16.gmra.mxu3 %v1117_v31 }
  0x6d   :  { %402 = vmatmul.bf16.gmra.mxu0 %v1094_v20  ;;  %442 = vmatmul.bf16.gmra.mxu1 %v1102_v21 }
  0x6e   :  { %482 = vmatmul.bf16.gmra.mxu2 %v1110_v26  ;;  %522 = vmatmul.bf16.gmra.mxu3 %v1118_v35 }
  0x7d   :  { %407 = vmatmul.bf16.gmra.mxu0 %v1095_v24  ;;  %447 = vmatmul.bf16.gmra.mxu1 %v1103_v25 }
  0x7e   :  { %487 = vmatmul.bf16.gmra.mxu2 %v1111_v30  ;;  %527 = vmatmul.bf16.gmra.mxu3 %v1119_v39 }
  0x8d   :  { %412 = vmatmul.bf16.gmra.mxu0 %v1096_v28  ;;  %452 = vmatmul.bf16.gmra.mxu1 %v1104_v29 }
  0x8e   :  { %492 = vmatmul.bf16.gmra.mxu2 %v1112_v34  ;;  %532 = vmatmul.bf16.gmra.mxu3 %v1120_v53 }
  0x9d   :  { %417 = vmatmul.bf16.gmra.mxu0 %v1097_v32  ;;  %457 = vmatmul.bf16.gmra.mxu1 %v1105_v33 }
  0x9e   :  { %497 = vmatmul.bf16.gmra.mxu2 %v1113_v38  ;;  %537 = vmatmul.bf16.gmra.mxu3 %v1121_v5 }
  0xaa   :  { %v383_v36 = vpop.f32.mrf.mxu0  ;;  %v1526_v37 = vpop.f32.mrf.mxu1 }
  0xab   :  { %v744_v40 = vmul.f32 %v383_v36, %v383_v36 }
  0xb1   :  { %v1538_v60 = vpop.f32.mrf.mxu2  ;;  %v1568_v20 = vpop.f32.mrf.mxu3 }
  0xb2   :  { %v385_v41 = vpop.f32.mrf.mxu0  ;;  %v1528_v42 = vpop.f32.mrf.mxu1 }
  0xb3   :  { %v1133_v43 = vpack.c.bf16 %v385_v41, %v383_v36  ;;  %v672_v44 = vadd.f32 %v385_v41, %v383_v36  ;;  %v745_v45 = vmul.f32 %v385_v41, %v385_v41  ;;  %v1173_v46 = vpack.c.bf16 %v1528_v42, %v1526_v37 }
  0xb5   :  { %1134 = vst [vmem:[#allocation7] sm:$0xff] %v1133_v43   ;;  %v808_v47 = vadd.f32 %v745_v45, %v744_v40 }
  0xb6   :  { %1297 = vst [vmem:[#allocation7 + $0x40] sm:$0xff] %v1173_v46  }
  0xb9   :  { %v1544_v2 = vpop.f32.mrf.mxu2  ;;  %v1574_v24 = vpop.f32.mrf.mxu3 }
  0xba   :  { %v388_v48 = vpop.f32.mrf.mxu0  ;;  %v1532_v49 = vpop.f32.mrf.mxu1  ;;  %v1213_v3 = vpack.c.bf16 %v1544_v2, %v1538_v60  ;;  %v1253_v26 = vpack.c.bf16 %v1574_v24, %v1568_v20 }
  0xbb   :  { %v673_v50 = vadd.f32 %v672_v44, %v388_v48  ;;  %v746_v51 = vmul.f32 %v388_v48, %v388_v48 }
  0xbc   :  { %1305 = vst [vmem:[#allocation7 + $0x80] sm:$0xff] %v1213_v3  }
  0xbd   :  { %v809_v52 = vadd.f32 %v808_v47, %v746_v51  ;;  %1313 = vst [vmem:[#allocation7 + $0xc0] sm:$0xff] %v1253_v26  }
  0xc1   :  { %v1554_v10 = vpop.f32.mrf.mxu2  ;;  %v1586_v32 = vpop.f32.mrf.mxu3 }
  0xc2   :  { %v390_v54 = vpop.f32.mrf.mxu0  ;;  %v1534_v55 = vpop.f32.mrf.mxu1 }
  0xc3   :  { %v1138_v56 = vpack.c.bf16 %v390_v54, %v388_v48  ;;  %v674_v57 = vadd.f32 %v673_v50, %v390_v54  ;;  %v747_v58 = vmul.f32 %v390_v54, %v390_v54  ;;  %v1178_v59 = vpack.c.bf16 %v1534_v55, %v1532_v49 }
  0xc5   :  { %1290 = vst [vmem:[#allocation7 + $0x8] sm:$0xff] %v1138_v56   ;;  %v810_v61 = vadd.f32 %v809_v52, %v747_v58 }
  0xc6   :  { %1298 = vst [vmem:[#allocation7 + $0x48] sm:$0xff] %v1178_v59  }
  0xc9   :  { %v1558_v13 = vpop.f32.mrf.mxu2  ;;  %v1592_v36 = vpop.f32.mrf.mxu3 }
  0xca   :  { %v393_v62 = vpop.f32.mrf.mxu0  ;;  %v1540_v63 = vpop.f32.mrf.mxu1  ;;  %v1218_v14 = vpack.c.bf16 %v1558_v13, %v1554_v10  ;;  %v1258_v39 = vpack.c.bf16 %v1592_v36, %v1586_v32 }
  0xcb   :  { %v1542_v0 = vadd.f32 %v674_v57, %v393_v62  ;;  %v748_v1 = vmul.f32 %v393_v62, %v393_v62 }
  0xcc   :  { %1306 = vst [vmem:[#allocation7 + $0x88] sm:$0xff] %v1218_v14  }
  0xcd   :  { %v1548_v4 = vadd.f32 %v810_v61, %v748_v1  ;;  %1314 = vst [vmem:[#allocation7 + $0xc8] sm:$0xff] %v1258_v39  }
  0xd1   :  { %v1566_v19 = vpop.f32.mrf.mxu2  ;;  %v1604_v46 = vpop.f32.mrf.mxu3 }
  0xd2   :  { %v395_v6 = vpop.f32.mrf.mxu0  ;;  %v1550_v7 = vpop.f32.mrf.mxu1 }
  0xd3   :  { %v1143_v8 = vpack.c.bf16 %v395_v6, %v393_v62  ;;  %v1183_v9 = vpack.c.bf16 %v1550_v7, %v1540_v63  ;;  %v749_v52 = vmul.f32 %v395_v6, %v395_v6  ;;  %v676_v57 = vadd.f32 %v1542_v0, %v395_v6 }
  0xd5   :  { %1291 = vst [vmem:[#allocation7 + $0x10] sm:$0xff] %v1143_v8   ;;  %v812_v58 = vadd.f32 %v1548_v4, %v749_v52 }
  0xd6   :  { %1299 = vst [vmem:[#allocation7 + $0x50] sm:$0xff] %v1183_v9  }
  0xd9   :  { %v1572_v23 = vpop.f32.mrf.mxu2  ;;  %v1610_v51 = vpop.f32.mrf.mxu3 }
  0xda   :  { %v398_v11 = vpop.f32.mrf.mxu0  ;;  %v1556_v12 = vpop.f32.mrf.mxu1  ;;  %v1223_v25 = vpack.c.bf16 %v1572_v23, %v1566_v19  ;;  %v1263_v54 = vpack.c.bf16 %v1610_v51, %v1604_v46 }
  0xdb   :  { %v750_v56 = vmul.f32 %v398_v11, %v398_v11  ;;  %v677_v61 = vadd.f32 %v676_v57, %v398_v11 }
  0xdc   :  { %1307 = vst [vmem:[#allocation7 + $0x90] sm:$0xff] %v1223_v25  }
  0xdd   :  { %1315 = vst [vmem:[#allocation7 + $0xd0] sm:$0xff] %v1263_v54   ;;  %v813_v62 = vadd.f32 %v812_v58, %v750_v56 }
  0xe1   :  { %v1584_v31 = vpop.f32.mrf.mxu2 }
  0xe2   :  { %v400_v15 = vpop.f32.mrf.mxu0  ;;  %v1562_v16 = vpop.f32.mrf.mxu1 }
  0xe3   :  { %v1148_v17 = vpack.c.bf16 %v400_v15, %v398_v11  ;;  %v1188_v18 = vpack.c.bf16 %v1562_v16, %v1556_v12  ;;  %v751_v59 = vmul.f32 %v400_v15, %v400_v15  ;;  %v678_v8 = vadd.f32 %v677_v61, %v400_v15 }
  0xe5   :  { %1292 = vst [vmem:[#allocation7 + $0x18] sm:$0xff] %v1148_v17   ;;  %v814_v0 = vadd.f32 %v813_v62, %v751_v59 }
  0xe6   :  { %1300 = vst [vmem:[#allocation7 + $0x58] sm:$0xff] %v1188_v18   ;;  %v1624_v18 = vpop.f32.mrf.mxu3 }
  0xe9   :  { %v1590_v35 = vpop.f32.mrf.mxu2 }
  0xea   :  { %v403_v21 = vpop.f32.mrf.mxu0  ;;  %v1570_v22 = vpop.f32.mrf.mxu1  ;;  %v1228_v38 = vpack.c.bf16 %v1590_v35, %v1584_v31 }
  0xeb   :  { %v752_v1 = vmul.f32 %v403_v21, %v403_v21  ;;  %v679_v25 = vadd.f32 %v678_v8, %v403_v21 }
  0xec   :  { %1308 = vst [vmem:[#allocation7 + $0x98] sm:$0xff] %v1228_v38  }
  0xed   :  { %v815_v4 = vadd.f32 %v814_v0, %v752_v1 }
  0xee   :  { %v1630_v54 = vpop.f32.mrf.mxu3 }
  0xf1   :  { %v1602_v45 = vpop.f32.mrf.mxu2 }
  0xf2   :  { %v405_v27 = vpop.f32.mrf.mxu0  ;;  %v1580_v28 = vpop.f32.mrf.mxu1 }
  0xf3   :  { %v1153_v29 = vpack.c.bf16 %v405_v27, %v403_v21  ;;  %v1193_v30 = vpack.c.bf16 %v1580_v28, %v1570_v22  ;;  %v753_v6 = vmul.f32 %v405_v27, %v405_v27  ;;  %v680_v26 = vadd.f32 %v679_v25, %v405_v27 }
  0xf4   :  { %v1268_v27 = vpack.c.bf16 %v1630_v54, %v1624_v18 }
  0xf5   :  { %1293 = vst [vmem:[#allocation7 + $0x20] sm:$0xff] %v1153_v29   ;;  %v816_v29 = vadd.f32 %v815_v4, %v753_v6 }
  0xf6   :  { %1301 = vst [vmem:[#allocation7 + $0x60] sm:$0xff] %v1193_v30  }
  0xf7   :  { %1316 = vst [vmem:[#allocation7 + $0xd8] sm:$0xff] %v1268_v27  }
  0xf9   :  { %v1608_v50 = vpop.f32.mrf.mxu2 }
  0xfa   :  { %v408_v33 = vpop.f32.mrf.mxu0  ;;  %v1588_v34 = vpop.f32.mrf.mxu1  ;;  %v1233_v53 = vpack.c.bf16 %v1608_v50, %v1602_v45 }
  0xfb   :  { %v754_v11 = vmul.f32 %v408_v33, %v408_v33  ;;  %v681_v38 = vadd.f32 %v680_v26, %v408_v33 }
  0xfc   :  { %1309 = vst [vmem:[#allocation7 + $0xa0] sm:$0xff] %v1233_v53  }
  0xfd   :  { %v817_v15 = vadd.f32 %v816_v29, %v754_v11  ;;  %v761_v29 = vmul.f32 %v1528_v42, %v1528_v42 }
 0x101   :  { %v1622_v17 = vpop.f32.mrf.mxu2 }
 0x102   :  { %v410_v40 = vpop.f32.mrf.mxu0  ;;  %v1598_v41 = vpop.f32.mrf.mxu1 }
 0x103   :  { %v1158_v43 = vpack.c.bf16 %v410_v40, %v408_v33  ;;  %v1198_v44 = vpack.c.bf16 %v1598_v41, %v1588_v34  ;;  %v755_v30 = vmul.f32 %v410_v40, %v410_v40  ;;  %v682_v52 = vadd.f32 %v681_v38, %v410_v40 }
 0x105   :  { %1294 = vst [vmem:[#allocation7 + $0x28] sm:$0xff] %v1158_v43   ;;  %v818_v56 = vadd.f32 %v817_v15, %v755_v30  ;;  %v762_v15 = vmul.f32 %v1532_v49, %v1532_v49 }
 0x106   :  { %1302 = vst [vmem:[#allocation7 + $0x68] sm:$0xff] %v1198_v44  }
 0x109   :  { %v1628_v53 = vpop.f32.mrf.mxu2 }
 0x10a   :  { %v413_v47 = vpop.f32.mrf.mxu0  ;;  %v1606_v48 = vpop.f32.mrf.mxu1  ;;  %v1238_v57 = vpack.c.bf16 %v1628_v53, %v1622_v17 }
 0x10b   :  { %v756_v39 = vmul.f32 %v413_v47, %v413_v47  ;;  %v683_v58 = vadd.f32 %v682_v52, %v413_v47  ;;  %v763_v52 = vmul.f32 %v1534_v55, %v1534_v55 }
 0x10c   :  { %1310 = vst [vmem:[#allocation7 + $0xa8] sm:$0xff] %v1238_v57  }
 0x10d   :  { %v819_v33 = vadd.f32 %v818_v56, %v756_v39 }
 0x111   :  { %v1640_v4 = vpop.f32.mrf.mxu2 }
 0x112   :  { %v415_v3 = vpop.f32.mrf.mxu0  ;;  %v1618_v5 = vpop.f32.mrf.mxu1 }
 0x113   :  { %v1163_v9 = vpack.c.bf16 %v415_v3, %v413_v47  ;;  %v1203_v14 = vpack.c.bf16 %v1618_v5, %v1606_v48  ;;  %v757_v21 = vmul.f32 %v415_v3, %v415_v3  ;;  %v684_v61 = vadd.f32 %v683_v58, %v415_v3  ;;  %v1642_v47 = vpop.f32.mrf.mxu3 }
 0x114   :  { %v760_v3 = vmul.f32 %v1526_v37, %v1526_v37 }
 0x115   :  { %1295 = vst [vmem:[#allocation7 + $0x30] sm:$0xff] %v1163_v9   ;;  %v820_v62 = vadd.f32 %v819_v33, %v757_v21 }
 0x116   :  { %1303 = vst [vmem:[#allocation7 + $0x70] sm:$0xff] %v1203_v14  }
 0x119   :  { %v1656_v21 = vpop.f32.mrf.mxu2 }
 0x11a   :  { %v418_v43 = vpop.f32.mrf.mxu0  ;;  %v1626_v44 = vpop.f32.mrf.mxu1 }
 0x11b   :  { %v758_v59 = vmul.f32 %v418_v43, %v418_v43  ;;  %v685_v40 = vadd.f32 %v684_v61, %v418_v43  ;;  %v1658_v57 = vpop.f32.mrf.mxu3 }
 0x11c   :  { %v1273_v27 = vpack.c.bf16 %v1658_v57, %v1642_v47 }
 0x11d   :  { %v821_v1 = vadd.f32 %v820_v62, %v758_v59  ;;  %v766_v62 = vmul.f32 %v1556_v12, %v1556_v12 }
 0x11e   :  { %1317 = vst [vmem:[#allocation7 + $0xe0] sm:$0xff] %v1273_v27   ;;  %v773_v27 = vmul.f32 %v1618_v5, %v1618_v5 }
 0x122   :  { %v420_v8 = vpop.f32.mrf.mxu0  ;;  %v1636_v9 = vpop.f32.mrf.mxu1 }
 0x123   :  { %v1168_v14 = vpack.c.bf16 %v420_v8, %v418_v43  ;;  %v686_v0 = vadd.f32 %v685_v40, %v420_v8  ;;  %v759_v6 = vmul.f32 %v420_v8, %v420_v8  ;;  %v1208_v25 = vpack.c.bf16 %v1636_v9, %v1626_v44 }
 0x124   :  { %v767_v8 = vmul.f32 %v1562_v16, %v1562_v16 }
 0x125   :  { %1296 = vst [vmem:[#allocation7 + $0x38] sm:$0xff] %v1168_v14   ;;  %v687_v11 = vadd.f32 %v686_v0, %v1526_v37  ;;  %v822_v26 = vadd.f32 %v821_v1, %v759_v6  ;;  %v1676_v0 = vpop.f32.mrf.mxu2  ;;  %v1678_v6 = vpop.f32.mrf.mxu3 }
 0x126   :  { %1304 = vst [vmem:[#allocation7 + $0x78] sm:$0xff] %v1208_v25  }
 0x127   :  { %v688_v30 = vadd.f32 %v687_v11, %v1528_v42  ;;  %v823_v38 = vadd.f32 %v822_v26, %v760_v3  ;;  %v1243_v42 = vpack.c.bf16 %v1656_v21, %v1640_v4  ;;  %v769_v11 = vmul.f32 %v1580_v28, %v1580_v28 }
 0x129   :  { %v689_v39 = vadd.f32 %v688_v30, %v1532_v49  ;;  %v824_v43 = vadd.f32 %v823_v38, %v761_v29  ;;  %v764_v49 = vmul.f32 %v1540_v63, %v1540_v63  ;;  %1311 = vst [vmem:[#allocation7 + $0xb0] sm:$0xff] %v1243_v42   ;;  %v771_v38 = vmul.f32 %v1598_v41, %v1598_v41 }
 0x12b   :  { %v690_v56 = vadd.f32 %v689_v39, %v1534_v55  ;;  %v825_v37 = vadd.f32 %v824_v43, %v762_v15  ;;  %v765_v55 = vmul.f32 %v1550_v7, %v1550_v7 }
 0x12d   :  { %v691_v58 = vadd.f32 %v690_v56, %v1540_v63  ;;  %v826_v33 = vadd.f32 %v825_v37, %v763_v52  ;;  %v1694_v43 = vpop.f32.mrf.mxu3 }
 0x12e   :  { %v1278_v52 = vpack.c.bf16 %v1694_v43, %v1678_v6 }
 0x12f   :  { %v692_v59 = vadd.f32 %v691_v58, %v1550_v7  ;;  %v827_v61 = vadd.f32 %v826_v33, %v764_v49  ;;  %v768_v7 = vmul.f32 %v1570_v22, %v1570_v22  ;;  %v774_v33 = vmul.f32 %v1626_v44, %v1626_v44 }
 0x130   :  { %1318 = vst [vmem:[#allocation7 + $0xe8] sm:$0xff] %v1278_v52   ;;  %v784_v52 = vmul.f32 %v1602_v45, %v1602_v45 }
 0x131   :  { %v828_v40 = vadd.f32 %v827_v61, %v765_v55  ;;  %v693_v1 = vadd.f32 %v692_v59, %v1556_v12 }
 0x133   :  { %v694_v63 = vadd.f32 %v693_v1, %v1562_v16  ;;  %v829_v14 = vadd.f32 %v828_v40, %v766_v62  ;;  %v770_v16 = vmul.f32 %v1588_v34, %v1588_v34  ;;  %v776_v62 = vmul.f32 %v1538_v60, %v1538_v60 }
 0x134   :  { %v777_v1 = vmul.f32 %v1544_v2, %v1544_v2 }
 0x135   :  { %v695_v25 = vadd.f32 %v694_v63, %v1570_v22  ;;  %v830_v3 = vadd.f32 %v829_v14, %v767_v8  ;;  %v1692_v22 = vpop.f32.mrf.mxu2  ;;  %v1712_v61 = vpop.f32.mrf.mxu3  ;;  %v778_v63 = vmul.f32 %v1554_v10, %v1554_v10 }
 0x137   :  { %v696_v12 = vadd.f32 %v695_v25, %v1580_v28  ;;  %v831_v26 = vadd.f32 %v830_v3, %v768_v7  ;;  %v1248_v28 = vpack.c.bf16 %v1692_v22, %v1676_v0  ;;  %v779_v7 = vmul.f32 %v1558_v13, %v1558_v13 }
 0x139   :  { %v697_v29 = vadd.f32 %v696_v12, %v1588_v34  ;;  %v832_v30 = vadd.f32 %v831_v26, %v769_v11  ;;  %v772_v34 = vmul.f32 %v1606_v48, %v1606_v48  ;;  %1312 = vst [vmem:[#allocation7 + $0xb8] sm:$0xff] %v1248_v28  }
 0x13b   :  { %v698_v15 = vadd.f32 %v697_v29, %v1598_v41  ;;  %v833_v39 = vadd.f32 %v832_v30, %v770_v16 }
 0x13d   :  { %v699_v56 = vadd.f32 %v698_v15, %v1606_v48  ;;  %v834_v37 = vadd.f32 %v833_v39, %v771_v38  ;;  %v775_v48 = vmul.f32 %v1636_v9, %v1636_v9  ;;  %v783_v15 = vmul.f32 %v1590_v35, %v1590_v35 }
 0x13f   :  { %v835_v42 = vadd.f32 %v834_v37, %v772_v34  ;;  %v700_v41 = vadd.f32 %v699_v56, %v1618_v5  ;;  %v785_v34 = vmul.f32 %v1608_v50, %v1608_v50 }
 0x141   :  { %v836_v49 = vadd.f32 %v835_v42, %v773_v27  ;;  %v701_v58 = vadd.f32 %v700_v41, %v1626_v44  ;;  %v786_v42 = vmul.f32 %v1622_v17, %v1622_v17  ;;  %v787_v27 = vmul.f32 %v1628_v53, %v1628_v53 }
 0x143   :  { %v837_v55 = vadd.f32 %v836_v49, %v774_v33  ;;  %v702_v59 = vadd.f32 %v701_v58, %v1636_v9 }
 0x145   :  { %v703_v5 = vadd.f32 %v702_v59, %v1538_v60  ;;  %v838_v40 = vadd.f32 %v837_v55, %v775_v48  ;;  %v1726_v60 = vpop.f32.mrf.mxu3  ;;  %v788_v55 = vmul.f32 %v1640_v4, %v1640_v4 }
 0x146   :  { %v1283_v11 = vpack.c.bf16 %v1726_v60, %v1712_v61 }
 0x147   :  { %v704_v8 = vadd.f32 %v703_v5, %v1544_v2  ;;  %v839_v44 = vadd.f32 %v838_v40, %v776_v62  ;;  %v780_v2 = vmul.f32 %v1566_v19, %v1566_v19  ;;  %v790_v40 = vmul.f32 %v1676_v0, %v1676_v0 }
 0x148   :  { %1319 = vst [vmem:[#allocation7 + $0xf0] sm:$0xff] %v1283_v11   ;;  %v1486_v11 = vmov 0.0  }
 0x149   :  { %v705_v14 = vadd.f32 %v704_v8, %v1554_v10  ;;  %v840_v9 = vadd.f32 %v839_v44, %v777_v1  ;;  %v781_v10 = vmul.f32 %v1572_v23, %v1572_v23  ;;  %v791_v8 = vmul.f32 %v1692_v22, %v1692_v22  ;;  %52 = vst [vmem:[#allocation8] sm:$0x1] %v1486_v11 }
 0x14a   :  { %v792_v44 = vmul.f32 %v1568_v20, %v1568_v20  ;;  %53 = vst [vmem:[#allocation10] sm:$0x1] %v1486_v11 }
 0x14b   :  { %v706_v25 = vadd.f32 %v705_v14, %v1558_v13  ;;  %v841_v3 = vadd.f32 %v840_v9, %v778_v63  ;;  %v782_v13 = vmul.f32 %v1584_v31, %v1584_v31  ;;  %v793_v14 = vmul.f32 %v1574_v24, %v1574_v24 }
 0x14d   :  { %v707_v12 = vadd.f32 %v706_v25, %v1566_v19  ;;  %v842_v26 = vadd.f32 %v841_v3, %v779_v7  ;;  %v1742_v28 = vpop.f32.mrf.mxu3 }
 0x14f   :  { %v708_v16 = vadd.f32 %v707_v12, %v1572_v23  ;;  %v843_v29 = vadd.f32 %v842_v26, %v780_v2  ;;  %v796_v12 = vmul.f32 %v1604_v46, %v1604_v46 }
 0x151   :  { %v844_v30 = vadd.f32 %v843_v29, %v781_v10  ;;  %v709_v38 = vadd.f32 %v708_v16, %v1584_v31  ;;  %v797_v10 = vmul.f32 %v1610_v51, %v1610_v51  ;;  %v798_v29 = vmul.f32 %v1624_v18, %v1624_v18 }
 0x153   :  { %v710_v39 = vadd.f32 %v709_v38, %v1590_v35  ;;  %v845_v19 = vadd.f32 %v844_v30, %v782_v13 }
 0x155   :  { %v711_v23 = vadd.f32 %v710_v39, %v1602_v45  ;;  %v846_v56 = vadd.f32 %v845_v19, %v783_v15 }
 0x157   :  { %v712_v37 = vadd.f32 %v711_v23, %v1608_v50  ;;  %v847_v31 = vadd.f32 %v846_v56, %v784_v52  ;;  %v1759_v50 = vpop.f32.mrf.mxu3 }
 0x158   :  { %v1288_v58 = vpack.c.bf16 %v1759_v50, %v1742_v28 }
 0x159   :  { %v713_v35 = vadd.f32 %v712_v37, %v1622_v17  ;;  %v848_v41 = vadd.f32 %v847_v31, %v785_v34  ;;  %v803_v37 = vmul.f32 %v1694_v43, %v1694_v43 }
 0x15a   :  { %1320 = vst [vmem:[#allocation7 + $0xf8] sm:$0xff] %v1288_v58  }
 0x15b   :  { %v714_v45 = vadd.f32 %v713_v35, %v1628_v53  ;;  %v849_v49 = vadd.f32 %v848_v41, %v786_v42  ;;  %v789_v53 = vmul.f32 %v1656_v21, %v1656_v21  ;;  %891 = dma.vmem_to_hbm [thread:$0]  %s884_s1, 4096, %s886_s29, [#allocation4], %s1482_s23, %s1482_s23, %s1483_s24   ;;  %v804_v35 = vmul.f32 %v1712_v61, %v1712_v61 }
 0x15d   :  { %v850_v17 = vadd.f32 %v849_v49, %v787_v27  ;;  %v715_v33 = vadd.f32 %v714_v45, %v1640_v4  ;;  %v805_v45 = vmul.f32 %v1726_v60, %v1726_v60  ;;  %v806_v49 = vmul.f32 %v1742_v28, %v1742_v28 }
 0x15f   :  { %v851_v59 = vadd.f32 %v850_v17, %v788_v55  ;;  %v716_v48 = vadd.f32 %v715_v33, %v1656_v21  ;;  %v807_v17 = vmul.f32 %v1759_v50, %v1759_v50 }
 0x161   :  { %v852_v62 = vadd.f32 %v851_v59, %v789_v53  ;;  %v717_v5 = vadd.f32 %v716_v48, %v1676_v0  ;;  %v794_v0 = vmul.f32 %v1586_v32, %v1586_v32 }
 0x163   :  { %v853_v1 = vadd.f32 %v852_v62, %v790_v40  ;;  %v718_v4 = vadd.f32 %v717_v5, %v1692_v22  ;;  %v795_v22 = vmul.f32 %v1592_v36, %v1592_v36 }
 0x165   :  { %v719_v21 = vadd.f32 %v718_v4, %v1568_v20  ;;  %v854_v63 = vadd.f32 %v853_v1, %v791_v8  ;;  %v671_v1 = vld [vmem:[#allocation8] sm:$0x1] }
 0x167   :  { %v720_v9 = vadd.f32 %v719_v21, %v1574_v24  ;;  %v855_v7 = vadd.f32 %v854_v63, %v792_v44 }
 0x169   :  { %v721_v25 = vadd.f32 %v720_v9, %v1586_v32  ;;  %v856_v3 = vadd.f32 %v855_v7, %v793_v14 }
 0x16b   :  { %v722_v20 = vadd.f32 %v721_v25, %v1592_v36  ;;  %v857_v2 = vadd.f32 %v856_v3, %v794_v0  ;;  %v799_v36 = vmul.f32 %v1630_v54, %v1630_v54 }
 0x16d   :  { %v723_v24 = vadd.f32 %v722_v20, %v1604_v46  ;;  %v858_v26 = vadd.f32 %v857_v2, %v795_v22  ;;  %v800_v46 = vmul.f32 %v1642_v47, %v1642_v47 }
 0x16f   :  { %v724_v32 = vadd.f32 %v723_v24, %v1610_v51  ;;  %v859_v16 = vadd.f32 %v858_v26, %v796_v12  ;;  %v801_v51 = vmul.f32 %v1658_v57, %v1658_v57 }
 0x171   :  { %v860_v13 = vadd.f32 %v859_v16, %v797_v10  ;;  %v725_v30 = vadd.f32 %v724_v32, %v1624_v18  ;;  %v802_v18 = vmul.f32 %v1678_v6, %v1678_v6 }
 0x173   :  { %v726_v38 = vadd.f32 %v725_v30, %v1630_v54  ;;  %v861_v15 = vadd.f32 %v860_v13, %v798_v29 }
 0x175   :  { %v727_v39 = vadd.f32 %v726_v38, %v1642_v47  ;;  %v862_v19 = vadd.f32 %v861_v15, %v799_v36 }
 0x177   :  { %v728_v52 = vadd.f32 %v727_v39, %v1658_v57  ;;  %v863_v23 = vadd.f32 %v862_v19, %v800_v46 }
 0x179   :  { %v729_v56 = vadd.f32 %v728_v52, %v1678_v6  ;;  %v864_v34 = vadd.f32 %v863_v23, %v801_v51 }
 0x17b   :  { %v730_v54 = vadd.f32 %v729_v56, %v1694_v43  ;;  %v865_v31 = vadd.f32 %v864_v34, %v802_v18 }
 0x17d   :  { %v866_v47 = vadd.f32 %v865_v31, %v803_v37  ;;  %v731_v42 = vadd.f32 %v730_v54, %v1712_v61 }
 0x17f   :  { %v867_v57 = vadd.f32 %v866_v47, %v804_v35  ;;  %v732_v41 = vadd.f32 %v731_v42, %v1726_v60 }
 0x181   :  { %v868_v6 = vadd.f32 %v867_v57, %v805_v45  ;;  %v733_v27 = vadd.f32 %v732_v41, %v1742_v28 }
 0x183   :  { %v869_v43 = vadd.f32 %v868_v6, %v806_v49  ;;  %v734_v58 = vadd.f32 %v733_v27, %v1759_v50  ;;  %v743_v50 = vld [vmem:[#allocation10] sm:$0x1] }
 0x185   :  { %v735_v33 = vrot.slane %v734_v58, 4  ;;  %v870_v61 = vadd.f32 %v869_v43, %v807_v17 }
 0x187   :  { %v736_v55 = vadd.f32 %v735_v33, %v734_v58  ;;  %v871_v59 = vrot.slane %v870_v61, 4 }
 0x189   :  { %v737_v48 = vrot.slane %v736_v55, 2  ;;  %v872_v53 = vadd.f32 %v871_v59, %v870_v61 }
 0x18b   :  { %v738_v62 = vadd.f32 %v737_v48, %v736_v55  ;;  %v873_v60 = vrot.slane %v872_v53, 2 }
 0x18d   :  { %v739_v5 = vrot.slane %v738_v62, 1  ;;  %v874_v40 = vadd.f32 %v873_v60, %v872_v53 }
 0x18f   :  { %v740_v28 = vadd.f32 %v739_v5, %v738_v62  ;;  %v875_v4 = vrot.slane %v874_v40, 1 }
 0x191   :  { %v876_v8 = vadd.f32 %v875_v4, %v874_v40  ;;  %v741_v44 = vadd.f32 %v740_v28, %v671_v1 }
 0x193   :  { %742 = vst [vmem:[#allocation8] sm:$0x1] %v741_v44  ;;  %v877_v21 = vadd.f32 %v876_v8, %v743_v50 }
 0x194   :  { %902 = dma.vmem_to_hbm [thread:$0]  %s898_s30, 16, %s900_s7, [#allocation9]  }
 0x195   :  { %878 = vst [vmem:[#allocation10] sm:$0x1] %v877_v21 }
 0x196   :  { %913 = dma.vmem_to_hbm [thread:$0]  %s909_s9, 16, %s911_s12, [#allocation9]  }
 0x197   :  { %1477 = dma.done.wait [#allocation4], 4096  }
 0x198   :  { %1478 = vsyncadd [#allocation4], 4294963200 }
 0x199   :  { %1479 = dma.done.wait [#allocation9], 32  }
 0x19a   :  { %1480 = vsyncadd [#allocation9], 4294967264 }
 0x19b   :  { %926 = vsyncpa [#allocation3], 1 }
 0x19c   :  { %927 = vsyncpa [#allocation6], 1 }
 0x19d   :  { %928 = vsyncpa [#allocation4], 1 }
 0x19e   :  { %929 = vsyncpa [#allocation9], 1 }

</bundles_post_ra>
